<compile_context>
chip_gen: v6e
topology: v6e:2x2x1
jax: 0.10.0
libtpu: 0.0.40
codegen_flags: <defaults>
</compile_context>

<pallas_src>
import math

import jax
import jax.numpy as jnp
from jax.experimental import pallas as pl
from jax.experimental.pallas import tpu as pltpu

_MIB = 1024 * 1024


# --------------------------------------------------------------------------- #
# Hardware-derived sizing
# --------------------------------------------------------------------------- #
def _sublane_multiple(dtype) -> int:
    # Sub-32-bit dtypes pack along sublanes: f32 -> 8, bf16 -> 16, int8 -> 32.
    itemsize = jnp.dtype(dtype).itemsize
    return max(8, 32 // max(1, itemsize))


def _vmem_capacity_bytes() -> int:
    try:
        info = pltpu.get_tpu_info()
        cap = int(getattr(info, "vmem_capacity_bytes", 0) or 0)
        if cap > 0:
            return cap
    except Exception:
        pass
    return 64 * _MIB  # conservative: v7x has 64 MiB of VMEM per TensorCore


def _generation_budget():
    """Returns (target HBM bytes moved per grid step, vmem_limit_bytes)."""
    cap = _vmem_capacity_bytes()
    if cap >= 96 * _MIB:
        # v5e / v6e: 128 MiB physical VMEM -> big steps to amortize the
        # ~0.35 us per-step overhead; double buffering (2x step bytes) stays
        # comfortably under the 64 MiB scoped limit.
        return 16 * _MIB, 64 * _MIB
    # v7x: only 64 MiB VMEM per TC, but 3.2 TB/s HBM makes per-step overhead
    # proportionally worse -> still-large 12 MiB steps under a 48 MiB limit.
    return 12 * _MIB, 48 * _MIB


def _choose_row_tile(n_rows, bytes_per_row, sublane, target_bytes, min_steps=2):
    """Row tile for a cdiv grid: a sublane multiple (or the full row count).

    Sized to move ~target_bytes of HBM traffic (in + out) per grid step while,
    when legally possible, leaving >= min_steps grid steps so v7x can shard the
    copy across its two TensorCores.
    """
    if n_rows <= sublane:
        return n_rows  # cannot split legally; single full-height block
    budget_rows = max(1, target_bytes // max(1, bytes_per_row))
    cap_rows = max(sublane, -(-n_rows // min_steps))  # ceil(n_rows / min_steps)
    tile = min(n_rows, budget_rows, cap_rows)
    tile = (tile // sublane) * sublane
    if tile == 0:
        tile = sublane  # minimum legal tile; caller re-checks the VMEM budget
    return tile


# --------------------------------------------------------------------------- #
# Kernels
# --------------------------------------------------------------------------- #
def _make_lane_concat_kernel(inner_sizes):
    """Copies each input block into its (128-aligned) lane slice of the output."""
    offsets = []
    off = 0
    for s in inner_sizes:
        offsets.append(off)
        off += s

    def kernel(*refs):
        o_ref = refs[-1]
        for x_ref, start, size in zip(refs[:-1], offsets, inner_sizes):
            # Static slice; start/size are multiples of 128 (gated in the
            # wrapper), so every store is an unmasked full-lane vst.
            o_ref[:, start:start + size] = x_ref[...]

    return kernel


def _make_row_concat_kernel(num_inputs, row_offsets, row_counts):
    """dim-0 concat: direct HBM->HBM DMA of each input into its row range."""

    def kernel(*refs):
        x_refs = refs[:num_inputs]
        o_ref = refs[num_inputs]
        sem = refs[num_inputs + 1]
        copies = []
        for i in range(num_inputs):
            dst = o_ref.at[row_offsets[i]:row_offsets[i] + row_counts[i], :]
            cp = pltpu.make_async_copy(x_refs[i], dst, sem.at[i])
            cp.start()
            copies.append(cp)
        for cp in copies:
            cp.wait()

    return kernel


def _row_concat(flat_inputs, row_counts, inner, out_dtype):
    n = len(flat_inputs)
    offsets, off = [], 0
    for r in row_counts:
        offsets.append(off)
        off += r
    total_rows = off
    return pl.pallas_call(
        _make_row_concat_kernel(n, offsets, row_counts),
        out_shape=jax.ShapeDtypeStruct((total_rows, inner), out_dtype),
        in_specs=[pl.BlockSpec(memory_space=pl.ANY)] * n,
        out_specs=pl.BlockSpec(memory_space=pl.ANY),
        scratch_shapes=[pltpu.SemaphoreType.DMA((n,))],
    )(*flat_inputs)


# --------------------------------------------------------------------------- #
# Public wrapper
# --------------------------------------------------------------------------- #
def pallas_concat(inputs, dim: int = 1) -> jax.Array:
    """Pallas equivalent of torch.concat(inputs, dim=dim)."""
    inputs = [jnp.asarray(x) for x in inputs]
    if not inputs:
        raise ValueError("Concatenation requires at least one input.")

    ndim = inputs[0].ndim
    if ndim == 0:
        raise ValueError("Cannot concatenate 0-d arrays.")
    if not -ndim <= dim < ndim:
        raise ValueError(f"dim={dim} out of range for {ndim}-D inputs.")
    dim = dim % ndim

    out_dtype = jnp.result_type(*inputs)
    inputs = [x.astype(out_dtype) for x in inputs]

    ref_shape = inputs[0].shape
    for x in inputs[1:]:
        if x.ndim != ndim or any(
            x.shape[a] != ref_shape[a] for a in range(ndim) if a != dim
        ):
            raise ValueError("All inputs must match on every dim except `dim`.")

    out_shape = list(ref_shape)
    out_shape[dim] = sum(x.shape[dim] for x in inputs)
    out_shape = tuple(out_shape)

    # Zero-width inputs contribute nothing and would create 0-sized blocks.
    nonempty = [x for x in inputs if x.shape[dim] > 0]
    if not nonempty:
        return jnp.zeros(out_shape, out_dtype)
    if len(nonempty) == 1:
        return nonempty[0]
    inputs = nonempty

    itemsize = jnp.dtype(out_dtype).itemsize
    sublane = _sublane_multiple(out_dtype)
    target_step_bytes, vmem_limit = _generation_budget()

    n_rows = int(math.prod(ref_shape[:dim])) if dim > 0 else 1

    # ---------------- dim == 0 (or all leading dims == 1): row concat -------
    if n_rows == 1:
        inner = int(math.prod(ref_shape[dim + 1:]))
        row_counts = [int(x.shape[dim]) for x in inputs]
        offsets_ok = all(
            sum(row_counts[:i]) % sublane == 0 for i in range(1, len(row_counts))
        )
        if inner > 0 and offsets_ok:
            flat = [x.reshape(r, inner) for x, r in zip(inputs, row_counts)]
            out2d = _row_concat(flat, row_counts, inner, out_dtype)
            return out2d.reshape(out_shape)
        # TODO(synk): row offsets not sublane-aligned (or zero inner width);
        # fall back to XLA instead of emitting sub-tile-aligned HBM DMAs.
        return jnp.concatenate(inputs, axis=dim)

    # ---------------- dim > 0: lane-dense concat along the last flat axis ---
    inner_sizes = [int(math.prod(x.shape[dim:])) for x in inputs]
    total_inner = sum(inner_sizes)

    if any(s % 128 != 0 for s in inner_sizes):
        # TODO(synk): unaligned inner widths would lower to masked vst + XLU
        # shifts; a strided HBM->HBM DMA remedial path could cover these.
        return jnp.concatenate(inputs, axis=dim)

    bytes_per_row = 2 * total_inner * itemsize  # HBM read + write per out row
    tile_rows = _choose_row_tile(n_rows, bytes_per_row, sublane, target_step_bytes)
    # Double-buffered resident VMEM ~= 2 x (sum of input blocks + output block).
    if 2 * tile_rows * bytes_per_row > vmem_limit - 2 * _MIB:
        # TODO(synk): even the minimum legal block overflows the VMEM budget
        # (tiny row count with an enormous row); fall back to XLA.
        return jnp.concatenate(inputs, axis=dim)

    flat_inputs = [x.reshape(n_rows, s) for x, s in zip(inputs, inner_sizes)]
    grid = (pl.cdiv(n_rows, tile_rows),)

    index_map = lambda r: (r, 0)
    in_specs = [pl.BlockSpec((tile_rows, s), index_map) for s in inner_sizes]
    out_spec = pl.BlockSpec((tile_rows, total_inner), index_map)

    flat_out = pl.pallas_call(
        _make_lane_concat_kernel(inner_sizes),
        out_shape=jax.ShapeDtypeStruct((n_rows, total_inner), out_dtype),
        grid_spec=pltpu.PrefetchScalarGridSpec(
            num_scalar_prefetch=0,
            grid=grid,
            in_specs=in_specs,
            out_specs=out_spec,
        ),
        compiler_params=pltpu.CompilerParams(
            # Row tiles are independent -> shard across v7x's two TensorCores.
            dimension_semantics=("parallel",),
            vmem_limit_bytes=vmem_limit,
        ),
    )(*flat_inputs)

    return flat_out.reshape(out_shape)


class Concatenation:
    """Mirror of the PyTorch module: concatenates tensors along `dim`."""

    def __init__(self, dim: int = 1):
        self.dim = dim

    def __call__(self, *inputs):
        return pallas_concat(list(inputs), dim=self.dim)


# --------------------------------------------------------------------------- #
# Demo / self-check
# --------------------------------------------------------------------------- #
if __name__ == "__main__":
    key = jax.random.PRNGKey(0)
    k0, k1, k2, k3, k4, k5, k6 = jax.random.split(key, 7)

    layer = Concatenation(dim=1)

    # 1) NCHW channel concat (aligned lane path, single full-height block):
    #    (2,4,16,16) ++ (2,4,16,16) ++ (2,2,16,16) -> (2,10,16,16)
    x0 = jax.random.normal(k0, (2, 4, 16, 16), dtype=jnp.float32)
    x1 = jax.random.normal(k1, (2, 4, 16, 16), dtype=jnp.float32)
    x2 = jax.random.normal(k2, (2, 2, 16, 16), dtype=jnp.float32)
    y = jax.block_until_ready(layer(x0, x1, x2))
    ref = jnp.concatenate([x0, x1, x2], axis=1)
    assert y.shape == ref.shape == (2, 10, 16, 16), y.shape
    assert y.dtype == ref.dtype
    assert bool(jnp.array_equal(y, ref))

    # 2) Aligned lane path with a cdiv grid (partial last row-tile).
    a0 = jax.random.normal(k3, (20, 128), dtype=jnp.float32)
    a1 = jax.random.normal(k4, (20, 256), dtype=jnp.float32)
    y2 = jax.block_until_ready(pallas_concat([a0, a1], dim=1))
    assert bool(jnp.array_equal(y2, jnp.concatenate([a0, a1], axis=1)))

    # 3) dim=0 concat -> direct HBM->HBM DMA row path (no VMEM staging).
    b0 = jax.random.normal(k5, (8, 128), dtype=jnp.float32)
    b1 = jax.random.normal(k6, (16, 128), dtype=jnp.float32)
    y3 = jax.block_until_ready(pallas_concat([b0, b1], dim=0))
    assert bool(jnp.array_equal(y3, jnp.concatenate([b0, b1], axis=0)))

    # 4) Unaligned inner widths take the documented XLA fallback.
    c0 = jax.random.normal(k0, (2, 3, 5, 7), dtype=jnp.float32)
    c1 = jax.random.normal(k1, (2, 2, 5, 7), dtype=jnp.float32)
    y4 = jax.block_until_ready(pallas_concat([c0, c1], dim=1))
    assert bool(jnp.array_equal(y4, jnp.concatenate([c0, c1], axis=1)))

    print("KERNEL_OK")
</pallas_src>

<mosaic_0001>
module attributes {stable_mosaic.version = 11 : i64} {
  func.func @kernel(%arg0: i32, %arg1: memref<2x1024xf32, #tpu.memory_space<vmem>>, %arg2: memref<2x1024xf32, #tpu.memory_space<vmem>>, %arg3: memref<2x512xf32, #tpu.memory_space<vmem>>, %arg4: memref<2x2560xf32, #tpu.memory_space<vmem>>) attributes {dimension_semantics = [#tpu.dimension_semantics<parallel>], iteration_bounds = array<i64: 1>, scalar_prefetch = 0 : i64, scratch_operands = 0 : i64, tpu.core_type = #tpu.core_type<tc>, window_params = [{transform_indices = @transform_0, window_bounds = array<i64: 2, 1024>}, {transform_indices = @transform_1, window_bounds = array<i64: 2, 1024>}, {transform_indices = @transform_2, window_bounds = array<i64: 2, 512>}, {transform_indices = @transform_3, window_bounds = array<i64: 2, 2560>}]} {
    %c0 = arith.constant 0 : index
    %c0_0 = arith.constant 0 : index
    %0 = vector.load %arg1[%c0, %c0_0] : memref<2x1024xf32, #tpu.memory_space<vmem>>, vector<2x1024xf32>
    %c0_1 = arith.constant 0 : index
    %c0_2 = arith.constant 0 : index
    %1 = vector.load %arg4[%c0_1, %c0_2] : memref<2x2560xf32, #tpu.memory_space<vmem>>, vector<2x1024xf32>
    tpu.vector_store %arg4[%c0_1, %c0_2], %0 {strides = array<i32>} : memref<2x2560xf32, #tpu.memory_space<vmem>>, vector<2x1024xf32>,
    %c0_3 = arith.constant 0 : index
    %c0_4 = arith.constant 0 : index
    %2 = vector.load %arg2[%c0_3, %c0_4] : memref<2x1024xf32, #tpu.memory_space<vmem>>, vector<2x1024xf32>
    %c0_5 = arith.constant 0 : index
    %c1024 = arith.constant 1024 : index
    %3 = vector.load %arg4[%c0_5, %c1024] : memref<2x2560xf32, #tpu.memory_space<vmem>>, vector<2x1024xf32>
    tpu.vector_store %arg4[%c0_5, %c1024], %2 {strides = array<i32>} : memref<2x2560xf32, #tpu.memory_space<vmem>>, vector<2x1024xf32>,
    %c0_6 = arith.constant 0 : index
    %c0_7 = arith.constant 0 : index
    %4 = vector.load %arg3[%c0_6, %c0_7] : memref<2x512xf32, #tpu.memory_space<vmem>>, vector<2x512xf32>
    %c0_8 = arith.constant 0 : index
    %c2048 = arith.constant 2048 : index
    %5 = vector.load %arg4[%c0_8, %c2048] : memref<2x2560xf32, #tpu.memory_space<vmem>>, vector<2x512xf32>
    tpu.vector_store %arg4[%c0_8, %c2048], %4 {strides = array<i32>} : memref<2x2560xf32, #tpu.memory_space<vmem>>, vector<2x512xf32>,
    return
  }
  func.func @transform_0(%arg0: i32) -> (i32, i32) {
    %c0_i32 = arith.constant 0 : i32
    %c0_i32_0 = arith.constant 0 : i32
    return %arg0, %c0_i32 : i32, i32
  }
  func.func @transform_1(%arg0: i32) -> (i32, i32) {
    %c0_i32 = arith.constant 0 : i32
    %c0_i32_0 = arith.constant 0 : i32
    return %arg0, %c0_i32 : i32, i32
  }
  func.func @transform_2(%arg0: i32) -> (i32, i32) {
    %c0_i32 = arith.constant 0 : i32
    %c0_i32_0 = arith.constant 0 : i32
    return %arg0, %c0_i32 : i32, i32
  }
  func.func @transform_3(%arg0: i32) -> (i32, i32) {
    %c0_i32 = arith.constant 0 : i32
    %c0_i32_0 = arith.constant 0 : i32
    return %arg0, %c0_i32 : i32, i32
  }
}

</mosaic_0001>

<bundles_post_ra>
// kernel: tpu_custom_call.1
= control target key start
LH: loop header
LB: loop body
LE: loop exit
PB: predicated region body
PF: predicated region fallthrough
CT: control target
= control target key end

     0   :  { %8 = vsyncpa [#allocation3], 0  ;;  %s202_s0 = inlined_call_operand.hbm [shape: f32[2,1024], index: 0, kind: input, shape index: {}]   ;;  %s203_s1 = inlined_call_operand.hbm [shape: f32[2,1024], index: 1, kind: input, shape index: {}]   ;;  %s204_s2 = inlined_call_operand.hbm [shape: f32[2,512], index: 2, kind: input, shape index: {}]   ;;  %s205_s3 = inlined_call_operand.hbm [shape: f32[2,2560], index: 3, kind: output, shape index: {}]  }
   0x1   :  { %9 = vsyncpa [#allocation6], 0 }
   0x2   :  { %10 = vsyncpa [#allocation4], 0  ;;  %s166_s12 = smov [#allocation5]   ;;  %s167_s14 = smov [#allocation2]  }
   0x3   :  { %s27_s13 = sshll.u32 %s166_s12, 4  ;;  %s17_s15 = sshll.u32 %s167_s14, 4  ;;  %s28_s13 = int_to_ptr.vmem [resolvable:$true] %s27_s13  ;;  %s18_s15 = int_to_ptr.vmem [resolvable:$true] %s17_s15 }
   0x4   :  { %s88_s16 = scalar_lea.vmem %s28_s13, 256  ;;  %p93_p1 = scmp.lt.s32.totalorder %s28_s13, %s28_s13 }
   0x5   :  { %p89_p0 = scmp.ne.s32.totalorder %s28_s13, %s88_s16  ;;  %p94_p2 = scmp.lt.s32.totalorder %s88_s16, %s88_s16 }
   0x7   :  { %p95_p3 = por %p94_p2, %p93_p1 }
   0x9   :  { %p96_p4 = pnand %p95_p3, %p89_p0 }
   0xb   :  { %99 = shalt.err (!%p96_p4)
}
   0xc   :  { %30 = dma.hbm_to_vmem [thread:$0]  %s203_s1, 256, %s28_s13, [#allocation6]  }
   0xd   :  { %s108_s19 = scalar_lea.vmem %s18_s15, 256  ;;  %p113_p6 = scmp.lt.s32.totalorder %s18_s15, %s18_s15 }
   0xe   :  { %p109_p5 = scmp.ne.s32.totalorder %s18_s15, %s108_s19  ;;  %p114_p7 = scmp.lt.s32.totalorder %s108_s19, %s108_s19 }
  0x10   :  { %p115_p8 = por %p114_p7, %p113_p6 }
  0x12   :  { %p116_p9 = pnand %p115_p8, %p109_p5 }
  0x14   :  { %119 = shalt.err (!%p116_p9)
}
  0x15   :  { %20 = dma.hbm_to_vmem [thread:$0]  %s202_s0, 256, %s18_s15, [#allocation3]  }
  0x16   :  { %s168_s22 = smov [#allocation7]  }
  0x17   :  { %s37_s23 = sshll.u32 %s168_s22, 4  ;;  %s38_s23 = int_to_ptr.vmem [resolvable:$true] %s37_s23 }
  0x18   :  { %s128_s24 = scalar_lea.vmem %s38_s23, 128  ;;  %p133_p11 = scmp.lt.s32.totalorder %s38_s23, %s38_s23 }
  0x19   :  { %p129_p10 = scmp.ne.s32.totalorder %s38_s23, %s128_s24  ;;  %p134_p12 = scmp.lt.s32.totalorder %s128_s24, %s128_s24 }
  0x1b   :  { %p135_p13 = por %p134_p12, %p133_p11 }
  0x1d   :  { %p136_p0 = pnand %p135_p13, %p129_p10 }
  0x1f   :  { %139 = shalt.err (!%p136_p0)
}
  0x20   :  { %40 = dma.hbm_to_vmem [thread:$0]  %s204_s2, 128, %s38_s23, [#allocation6]  }
  0x21   :  { %160 = dma.done.wait [#allocation3], 256  }
  0x22   :  { %161 = vsyncadd [#allocation3], 4294967040 }
  0x23   :  { %162 = dma.done.wait [#allocation6], 384  }
  0x24   :  { %163 = vsyncadd [#allocation6], 4294966912  ;;  %s169_s26 = smov [#allocation8]   ;;  %v50_v0 = vld [vmem:[#allocation2] sm:$0xff]  ;;  %v51_v1 = vld [vmem:[#allocation2 + $0x8] sm:$0xff] }
  0x25   :  { %s66_s0 = sshll.u32 %s169_s26, 4  ;;  %v54_v2 = vld [vmem:[#allocation5] sm:$0xff]  ;;  %52 = vst [vmem:[#allocation8] sm:$0xff] %v50_v0  ;;  %53 = vst [vmem:[#allocation8 + $0x8] sm:$0xff] %v51_v1  ;;  %v55_v3 = vld [vmem:[#allocation5 + $0x8] sm:$0xff]  ;;  %s67_s0 = int_to_ptr.vmem [resolvable:$true] %s66_s0 }
  0x26   :  { %56 = vst [vmem:[#allocation8 + $0x10] sm:$0xff] %v54_v2  ;;  %v58_v4 = vld [vmem:[#allocation7] sm:$0xff]  ;;  %57 = vst [vmem:[#allocation8 + $0x18] sm:$0xff] %v55_v3  ;;  %s140_s27 = scalar_lea.vmem %s67_s0, 640  ;;  %p145_p2 = scmp.lt.s32.totalorder %s67_s0, %s67_s0 }
  0x27   :  { %59 = vst [vmem:[#allocation8 + $0x20] sm:$0xff] %v58_v4  ;;  %p141_p1 = scmp.ne.s32.totalorder %s67_s0, %s140_s27  ;;  %p146_p3 = scmp.lt.s32.totalorder %s140_s27, %s140_s27 }
  0x29   :  { %p147_p4 = por %p146_p3, %p145_p2 }
  0x2b   :  { %p148_p5 = pnand %p147_p4, %p141_p1 }
  0x2d   :  { %151 = shalt.err (!%p148_p5)
}
  0x2e   :  { %69 = dma.vmem_to_hbm [thread:$0]  %s67_s0, 640, %s205_s3, [#allocation4]  }
  0x2f   :  { %164 = dma.done.wait [#allocation4], 640  }
  0x30   :  { %165 = vsyncadd [#allocation4], 4294966656 }
  0x31   :  { %73 = vsyncpa [#allocation3], 1 }
  0x32   :  { %74 = vsyncpa [#allocation6], 1 }
  0x33   :  { %75 = vsyncpa [#allocation4], 1 }

</bundles_post_ra>
